<compile_context>
chip_gen: v6e
topology: v6e:2x2x1
jax: 0.10.0
libtpu: 0.0.40
codegen_flags: <defaults>
</compile_context>

<pallas_src>
import functools

import jax
import jax.numpy as jnp
import numpy as np
from jax.experimental import pallas as pl
from jax.experimental.pallas import tpu as pltpu


# ----------------------------------------------------------------------------
# Parameter / buffer construction (plain JAX glue, deterministic)
# ----------------------------------------------------------------------------
def precompute_freqs_cis(dim: int, end: int, theta: float = 10000.0,
                         theta_rescale_factor: float = 1.0) -> jnp.ndarray:
    """Matches the taproot/F5-TTS precompute_freqs_cis: cat([cos, sin], -1)."""
    theta = theta * theta_rescale_factor ** (dim / (dim - 2))
    freqs = 1.0 / (theta ** (jnp.arange(0, dim, 2)[: dim // 2].astype(jnp.float32) / dim))
    t = jnp.arange(end, dtype=jnp.float32)
    angles = jnp.outer(t, freqs)                       # (end, dim // 2)
    return jnp.concatenate([jnp.cos(angles), jnp.sin(angles)], axis=-1)  # (end, dim)


# ----------------------------------------------------------------------------
# Tiling heuristics
# ----------------------------------------------------------------------------
def _estimate_vmem_bytes(tm: int, t: int, v1: int, d: int) -> int:
    """Conservative VMEM residency estimate for one grid step.

    Double-buffering is assumed for the output and (conservatively) for the
    constant-index resident blocks; the one-hot intermediates are counted at
    ~3x (iota + mask + f32 one-hot live ranges).
    """
    out_b = 2 * tm * d * 4                       # output tile, double-buffered
    pe_rows = tm if tm % t == 0 else t
    pe_b = 2 * pe_rows * d * 4                   # resident positional slab
    tab_b = 2 * v1 * d * 4                       # resident embedding table
    tok_b = 2 * tm * 4                           # token column
    onehot_b = 3 * tm * v1 * 4                   # iota / compare / f32 one-hot
    return out_b + pe_b + tab_b + tok_b + onehot_b


def _pick_row_tile(m: int, t: int, v1: int, d: int,
                   budget: int = 12 * 1024 * 1024) -> int:
    """Rows of the flattened (B*T) dimension processed per grid step.

    Constraints:
      * TM divides M,
      * TM % T == 0 or T % TM == 0 (so the positional slab is never an
        (M, D) array and can stay resident with a constant index_map),
      * estimated VMEM residency under `budget`.
    Preference: largest TM that still leaves >= 8 grid steps AND moves
    >= 512 KiB of output per step; otherwise the largest feasible TM.
    """
    if m <= 0:
        return 1
    # Small problems: one full-extent step, no per-step overhead at all.
    if m <= 1024 and _estimate_vmem_bytes(m, t, v1, d) <= budget:
        return m

    feasible = []
    for tm in (2048, 1024, 512, 256, 128):       # all multiples of 8 (and 128)
        if m % tm != 0:
            continue
        if (tm % t != 0) and (t % tm != 0):
            continue
        if _estimate_vmem_bytes(tm, t, v1, d) > budget:
            continue
        feasible.append(tm)

    if feasible:
        for tm in feasible:                      # descending order
            if m // tm >= 8 and tm * d * 4 >= (1 << 19):
                return tm
        return feasible[0]                       # fewest, biggest steps

    # Fallback 1: tile exactly one sequence per step (pe slab stays (T, D)).
    if t % 8 == 0 and _estimate_vmem_bytes(t, t, v1, d) <= budget and m % t == 0:
        return t
    # Fallback 2: single full-extent step.  This is the only path that tiles
    # the positional slab out to M rows; it is taken only for non-nesting,
    # non-8-aligned shapes.
    return m


# ----------------------------------------------------------------------------
# Pallas kernel: token gather (one-hot matmul) + positional add, M-row tile
# ----------------------------------------------------------------------------
def text_embed_kernel(tok_ref, emb_ref, pe_ref, out_ref):
    # tok_ref: (1, TM, 1) i32        emb_ref: (V1, D) f32 (resident, copied once)
    # pe_ref : (TM, D) or (T, D) f32 (resident, copied once)
    # out_ref: (TM, D) f32
    tm = out_ref.shape[0]
    v1 = emb_ref.shape[0]

    tok = tok_ref[0]                                              # (TM, 1) column
    # One-hot with the vocab on the 128-lane axis (lane-dense), standard LHS.
    # Exact 0/1 selector -> the f32 MXU matmul reproduces the table row exactly.
    v_iota = jax.lax.broadcasted_iota(jnp.int32, (tm, v1), 1)     # (TM, V1)
    one_hot = (v_iota == tok).astype(jnp.float32)
    emb = jax.lax.dot_general(
        one_hot, emb_ref[...],
        dimension_numbers=(((1,), (0,)), ((), ())),               # (TM,V1)x(V1,D)
        preferred_element_type=jnp.float32)                       # (TM, D)

    if pe_ref.shape[0] == tm:
        # Row-block spans whole sequences: positional slab lines up 1:1.
        pe = pe_ref[...]
    else:
        # Row-block is a sub-window of one sequence (T % TM == 0): slice the
        # resident (T, D) slab in-kernel instead of re-DMAing per step.
        t_rows = pe_ref.shape[0]
        off = pl.multiple_of((pl.program_id(0) * tm) % t_rows, 8)
        pe = pe_ref[pl.ds(off, tm), :]

    out_ref[...] = emb + pe                                       # lane-dense store


# ----------------------------------------------------------------------------
# Wrapper (static index munging in plain JAX, hot path in the kernel)
# ----------------------------------------------------------------------------
@functools.partial(jax.jit, static_argnames=("seq_len", "drop_text"))
def text_embedding_forward(text, emb_table, freqs_cis,
                           seq_len=None, drop_text=False):
    text = text.astype(jnp.int32) + 1
    if seq_len is not None:
        text = text[:, :seq_len]
        pad = seq_len - text.shape[1]
        if pad > 0:
            text = jnp.pad(text, ((0, 0), (0, pad)), constant_values=0)
    if drop_text:
        text = jnp.zeros_like(text)

    B, T = text.shape
    V1, D = emb_table.shape
    P = freqs_cis.shape[0]

    M = B * T
    TM = _pick_row_tile(M, T, V1, D)
    G = M // TM

    # Positional rows for one sequence: pos_t = min(t, P - 1).
    if T <= P:
        pe_t = freqs_cis[:T]                                        # (T, D)
    else:
        pe_t = jnp.take(freqs_cis, jnp.minimum(jnp.arange(T), P - 1), axis=0)

    # Resident positional slab (constant block index -> DMA'd exactly once).
    if TM % T == 0:
        reps = TM // T
        pe = pe_t if reps == 1 else jnp.tile(pe_t, (reps, 1))       # (TM, D)
    else:                                                           # T % TM == 0
        pe = pe_t                                                   # (T, D)

    # Tokens presented as (G, TM, 1): each grid step gets the (TM, 1) column it
    # needs for the lane-broadcast compare with no in-kernel relayout.
    tok = text.reshape(G, TM, 1)

    est = _estimate_vmem_bytes(TM, T, V1, D)
    vmem_limit = int(min(max(int(1.5 * est), 16 << 20), 48 << 20))

    out_flat = pl.pallas_call(
        text_embed_kernel,
        out_shape=jax.ShapeDtypeStruct((M, D), jnp.float32),
        grid_spec=pltpu.PrefetchScalarGridSpec(
            num_scalar_prefetch=0,
            grid=(G,),
            in_specs=[
                pl.BlockSpec((1, TM, 1), lambda g: (g, 0, 0)),      # per-step tokens
                pl.BlockSpec((V1, D), lambda g: (0, 0)),            # resident table
                pl.BlockSpec(tuple(pe.shape), lambda g: (0, 0)),    # resident pe slab
            ],
            out_specs=pl.BlockSpec((TM, D), lambda g: (g, 0)),      # lane-dense writes
        ),
        compiler_params=pltpu.CompilerParams(
            dimension_semantics=("parallel",),
            vmem_limit_bytes=vmem_limit),
    )(tok, emb_table, pe)

    return out_flat.reshape(B, T, D)


# ----------------------------------------------------------------------------
if __name__ == "__main__":
    # Small, module-consistent shapes.
    B, T = 2, 8
    out_dim = 128
    text_num_embeds = 255          # embedding table has text_num_embeds + 1 rows
    precompute_max_pos = 1024

    key = jax.random.PRNGKey(0)
    k_emb, k_tok = jax.random.split(key)

    # Deterministic parameter init (nn.Embedding default: N(0, 1)).
    emb_table = jax.random.normal(
        k_emb, (text_num_embeds + 1, out_dim), dtype=jnp.float32)
    freqs_cis = precompute_freqs_cis(out_dim, precompute_max_pos)

    text = jax.random.randint(k_tok, (B, T), 0, text_num_embeds, dtype=jnp.int32)

    out = text_embedding_forward(text, emb_table, freqs_cis)
    out = jax.block_until_ready(out)

    # Pure-JAX reference for a correctness check.
    shifted = text.astype(jnp.int32) + 1
    pos = jnp.minimum(jnp.arange(T), precompute_max_pos - 1)
    ref = emb_table[shifted] + freqs_cis[pos][None, :, :]

    np.testing.assert_allclose(np.asarray(out), np.asarray(ref), rtol=1e-5, atol=1e-5)
    assert out.shape == (B, T, out_dim) and out.dtype == jnp.float32
    print("KERNEL_OK")
</pallas_src>

<mosaic_0001>
module attributes {stable_mosaic.version = 11 : i64} {
  func.func @text_embed_kernel(%arg0: i32, %arg1: memref<1x16x1xi32, #tpu.memory_space<vmem>>, %arg2: memref<256x128xf32, #tpu.memory_space<vmem>>, %arg3: memref<16x128xf32, #tpu.memory_space<vmem>>, %arg4: memref<16x128xf32, #tpu.memory_space<vmem>>) attributes {dimension_semantics = [#tpu.dimension_semantics<parallel>], iteration_bounds = array<i64: 1>, scalar_prefetch = 0 : i64, scratch_operands = 0 : i64, tpu.core_type = #tpu.core_type<tc>, window_params = [{transform_indices = @transform_0, window_bounds = array<i64: 1, 16, 1>}, {pipeline_mode = #tpu.pipeline_mode<synchronous>, transform_indices = @transform_1, window_bounds = array<i64: 256, 128>}, {pipeline_mode = #tpu.pipeline_mode<synchronous>, transform_indices = @transform_2, window_bounds = array<i64: 16, 128>}, {transform_indices = @transform_3, window_bounds = array<i64: 16, 128>}]} {
    %c0 = arith.constant 0 : index
    %c0_0 = arith.constant 0 : index
    %c0_1 = arith.constant 0 : index
    %0 = vector.load %arg1[%c0, %c0_0, %c0_1] : memref<1x16x1xi32, #tpu.memory_space<vmem>>, vector<1x16x1xi32>
    %1 = vector.shape_cast %0 : vector<1x16x1xi32> to vector<16x1xi32>
    %2 = tpu.iota {dimensions = array<i32: 1>} : vector<16x256xi32>
    %3 = vector.broadcast %1 : vector<16x1xi32> to vector<16x256xi32>
    %4 = arith.cmpi eq, %2, %3 : vector<16x256xi32>
    %5 = arith.extui %4 : vector<16x256xi1> to vector<16x256xi32>
    %6 = arith.sitofp %5 : vector<16x256xi32> to vector<16x256xf32>
    %c0_2 = arith.constant 0 : index
    %c0_3 = arith.constant 0 : index
    %7 = vector.load %arg2[%c0_2, %c0_3] : memref<256x128xf32, #tpu.memory_space<vmem>>, vector<256x128xf32>
    %cst = arith.constant dense<0.000000e+00> : vector<16x128xf32>
    %8 = tpu.matmul %6, %7, %cst {dimension_numbers = #tpu.dot_dimension_numbers<[1], [0], [0], [1], [0, 0, 1, 1], [], []>} : vector<16x256xf32>, vector<256x128xf32>, vector<16x128xf32> -> vector<16x128xf32>
    %c0_4 = arith.constant 0 : index
    %c0_5 = arith.constant 0 : index
    %9 = vector.load %arg3[%c0_4, %c0_5] : memref<16x128xf32, #tpu.memory_space<vmem>>, vector<16x128xf32>
    %10 = arith.addf %8, %9 : vector<16x128xf32>
    %c0_6 = arith.constant 0 : index
    %c0_7 = arith.constant 0 : index
    %11 = vector.load %arg4[%c0_6, %c0_7] : memref<16x128xf32, #tpu.memory_space<vmem>>, vector<16x128xf32>
    tpu.vector_store %arg4[%c0_6, %c0_7], %10 {strides = array<i32>} : memref<16x128xf32, #tpu.memory_space<vmem>>, vector<16x128xf32>,
    return
  }
  func.func @transform_0(%arg0: i32) -> (i32, i32, i32) {
    %c0_i32 = arith.constant 0 : i32
    %c0_i32_0 = arith.constant 0 : i32
    %c0_i32_1 = arith.constant 0 : i32
    return %arg0, %c0_i32, %c0_i32_0 : i32, i32, i32
  }
  func.func @transform_1(%arg0: i32) -> (i32, i32) {
    %c0_i32 = arith.constant 0 : i32
    %c0_i32_0 = arith.constant 0 : i32
    %c0_i32_1 = arith.constant 0 : i32
    return %c0_i32, %c0_i32_0 : i32, i32
  }
  func.func @transform_2(%arg0: i32) -> (i32, i32) {
    %c0_i32 = arith.constant 0 : i32
    %c0_i32_0 = arith.constant 0 : i32
    %c0_i32_1 = arith.constant 0 : i32
    return %c0_i32, %c0_i32_0 : i32, i32
  }
  func.func @transform_3(%arg0: i32) -> (i32, i32) {
    %c0_i32 = arith.constant 0 : i32
    %c0_i32_0 = arith.constant 0 : i32
    return %arg0, %c0_i32 : i32, i32
  }
}

</mosaic_0001>

<bundles_post_ra>
// kernel: text_embedding_forward.1
= control target key start
LH: loop header
LB: loop body
LE: loop exit
PB: predicated region body
PF: predicated region fallthrough
CT: control target
= control target key end

     0   :  { %8 = vsyncpa [#allocation3], 0  ;;  %s359_s0 = inlined_call_operand.vmem [shape: s32[1,16,1], index: 0, kind: input, shape index: {}]   ;;  %s360_s1 = inlined_call_operand.hbm [shape: f32[256,128], index: 1, kind: input, shape index: {}]   ;;  %s361_s2 = inlined_call_operand.vmem [shape: f32[16,128], index: 2, kind: input, shape index: {}]   ;;  %s362_s3 = inlined_call_operand.hbm [shape: f32[16,128], index: 3, kind: output, shape index: {}]  }
   0x1   :  { %9 = vsyncpa [#allocation4], 0  ;;  %s309_s12 = smov [#allocation2]  }
   0x2   :  { %s17_s13 = sshll.u32 %s309_s12, 4  ;;  %s18_s13 = int_to_ptr.vmem [resolvable:$true] %s17_s13 }
   0x3   :  { %s273_s14 = scalar_lea.vmem %s18_s13, 4096  ;;  %p278_p1 = scmp.lt.s32.totalorder %s18_s13, %s18_s13 }
   0x4   :  { %p274_p0 = scmp.ne.s32.totalorder %s18_s13, %s273_s14  ;;  %p279_p2 = scmp.lt.s32.totalorder %s273_s14, %s273_s14 }
   0x6   :  { %p280_p3 = por %p279_p2, %p278_p1 }
   0x8   :  { %p281_p4 = pnand %p280_p3, %p274_p0 }
   0xa   :  { %284 = shalt.err (!%p281_p4)
}
   0xb   :  { %s310_s15 = smov 128   ;;  %s311_s16 = smov 8  }
   0xc   :  { %23 = dma.hbm_to_vmem [thread:$0]  %s360_s1, 4096, %s18_s13, [#allocation3], %s310_s15, %s310_s15, %s311_s16  }
   0xd   :  { %305 = dma.done.wait [#allocation3], 4096  }
   0xe   :  { %306 = vsyncadd [#allocation3], 4294963200  ;;  %v312_v0 = vmov 0   ;;  %v29_v1 = vld [vmem:[%s359_s0] sm:$0xff]  ;;  %v83_v2 = vld [vmem:[#allocation2 + $0xf8] sm:$0xff]  ;;  %v31_v35 = vlaneseq  ;;  %v313_v39 = vmov 1.0  }
   0xf   :  { %264 = vset.pattern.permute.xlu0 %v312_v0  ;;  %188 = vmatprep.subr.mxu0 %v83_v2  ;;  %v67_v3 = vld [vmem:[#allocation2 + $0x78] sm:$0xff]  ;;  %v82_v4 = vld [vmem:[#allocation2 + $0xf0] sm:$0xff]  ;;  %v30_v6 = vld [vmem:[%s359_s0 + $0x8] sm:$0xff]  ;;  %s314_s25 = smov [#allocation5]  }
  0x10   :  { %35 = vperm.xlu0 %264, %v29_v1   ;;  %v66_v5 = vld [vmem:[#allocation2 + $0x70] sm:$0xff]  ;;  %189 = vmatpush3.msra.mxu0 %v67_v3  ;;  %v81_v7 = vld [vmem:[#allocation2 + $0xe8] sm:$0xff]  ;;  %v80_v9 = vld [vmem:[#allocation2 + $0xe0] sm:$0xff]  ;;  %v32_v36 = vand.u32 127, %v31_v35  ;;  %s168_s26 = sshll.u32 %s314_s25, 4  ;;  %s169_s26 = int_to_ptr.vmem [resolvable:$true] %s168_s26 }
  0x11   :  { %226 = vmatprep.subr.mxu1 %v83_v2  ;;  %190 = vmatprep.subr.mxu0 %v82_v4  ;;  %v65_v8 = vld [vmem:[#allocation2 + $0x68] sm:$0xff]  ;;  %v64_v10 = vld [vmem:[#allocation2 + $0x60] sm:$0xff]  ;;  %v79_v11 = vld [vmem:[#allocation2 + $0xd8] sm:$0xff]  ;;  %s285_s27 = scalar_lea.vmem %s169_s26, 256  ;;  %p290_p6 = scmp.lt.s32.totalorder %s169_s26, %s169_s26 }
  0x12   :  { %242 = vmatpush3.msra.mxu1 %v67_v3  ;;  %191 = vmatpush3.msra.mxu0 %v66_v5  ;;  %v63_v12 = vld [vmem:[#allocation2 + $0x58] sm:$0xff]  ;;  %v78_v13 = vld [vmem:[#allocation2 + $0xd0] sm:$0xff]  ;;  %v77_v15 = vld [vmem:[#allocation2 + $0xc8] sm:$0xff]  ;;  %v33_v37 = vadd.s32 128, %v32_v36  ;;  %p286_p5 = scmp.ne.s32.totalorder %s169_s26, %s285_s27  ;;  %p291_p7 = scmp.lt.s32.totalorder %s285_s27, %s285_s27 }
  0x13   :  { %227 = vmatprep.subr.mxu1 %v82_v4  ;;  %192 = vmatprep.subr.mxu0 %v81_v7  ;;  %v62_v14 = vld [vmem:[#allocation2 + $0x50] sm:$0xff]  ;;  %v61_v16 = vld [vmem:[#allocation2 + $0x48] sm:$0xff]  ;;  %v76_v17 = vld [vmem:[#allocation2 + $0xc0] sm:$0xff] }
  0x14   :  { %38 = vperm.xlu0 %264, %v30_v6   ;;  %193 = vmatpush3.msra.mxu0 %v65_v8  ;;  %v60_v18 = vld [vmem:[#allocation2 + $0x40] sm:$0xff]  ;;  %v75_v19 = vld [vmem:[#allocation2 + $0xb8] sm:$0xff]  ;;  %v74_v21 = vld [vmem:[#allocation2 + $0xb0] sm:$0xff]  ;;  %p292_p8 = por %p291_p7, %p290_p6 }
  0x15   :  { %243 = vmatpush3.msra.mxu1 %v66_v5  ;;  %194 = vmatprep.subr.mxu0 %v80_v9  ;;  %v59_v20 = vld [vmem:[#allocation2 + $0x38] sm:$0xff]  ;;  %v58_v22 = vld [vmem:[#allocation2 + $0x30] sm:$0xff]  ;;  %v73_v23 = vld [vmem:[#allocation2 + $0xa8] sm:$0xff] }
  0x16   :  { %228 = vmatprep.subr.mxu1 %v81_v7  ;;  %195 = vmatpush3.msra.mxu0 %v64_v10  ;;  %v57_v24 = vld [vmem:[#allocation2 + $0x28] sm:$0xff]  ;;  %v72_v25 = vld [vmem:[#allocation2 + $0xa0] sm:$0xff]  ;;  %v71_v27 = vld [vmem:[#allocation2 + $0x98] sm:$0xff]  ;;  %p293_p9 = pnand %p292_p8, %p286_p5 }
  0x17   :  { %244 = vmatpush3.msra.mxu1 %v65_v8  ;;  %196 = vmatprep.subr.mxu0 %v79_v11  ;;  %v56_v26 = vld [vmem:[#allocation2 + $0x20] sm:$0xff]  ;;  %v55_v28 = vld [vmem:[#allocation2 + $0x18] sm:$0xff]  ;;  %v70_v29 = vld [vmem:[#allocation2 + $0x90] sm:$0xff] }
  0x18   :  { %229 = vmatprep.subr.mxu1 %v80_v9  ;;  %197 = vmatpush3.msra.mxu0 %v63_v12  ;;  %v54_v30 = vld [vmem:[#allocation2 + $0x10] sm:$0xff]  ;;  %v69_v31 = vld [vmem:[#allocation2 + $0x88] sm:$0xff]  ;;  %v68_v33 = vld [vmem:[#allocation2 + $0x80] sm:$0xff] }
  0x19   :  { %245 = vmatpush3.msra.mxu1 %v64_v10  ;;  %198 = vmatprep.subr.mxu0 %v78_v13  ;;  %v53_v32 = vld [vmem:[#allocation2 + $0x8] sm:$0xff]  ;;  %v52_v34 = vld [vmem:[#allocation2] sm:$0xff] }
  0x1a   :  { %230 = vmatprep.subr.mxu1 %v79_v11  ;;  %199 = vmatpush3.msra.mxu0 %v62_v14  ;;  %v84_v42 = vld [vmem:[%s361_s2] sm:$0xff]  ;;  %v85_v47 = vld [vmem:[%s361_s2 + $0x8] sm:$0xff] }
  0x1b   :  { %246 = vmatpush3.msra.mxu1 %v63_v12  ;;  %200 = vmatprep.subr.mxu0 %v77_v15 }
  0x1c   :  { %231 = vmatprep.subr.mxu1 %v78_v13  ;;  %201 = vmatpush3.msra.mxu0 %v61_v16 }
  0x1d   :  { %247 = vmatpush3.msra.mxu1 %v62_v14  ;;  %202 = vmatprep.subr.mxu0 %v76_v17 }
  0x1e   :  { %232 = vmatprep.subr.mxu1 %v77_v15  ;;  %203 = vmatpush3.msra.mxu0 %v60_v18 }
  0x1f   :  { %248 = vmatpush3.msra.mxu1 %v61_v16  ;;  %204 = vmatprep.subr.mxu0 %v75_v19 }
  0x20   :  { %233 = vmatprep.subr.mxu1 %v76_v17  ;;  %205 = vmatpush3.msra.mxu0 %v59_v20 }
  0x21   :  { %249 = vmatpush3.msra.mxu1 %v60_v18  ;;  %206 = vmatprep.subr.mxu0 %v74_v21 }
  0x22   :  { %234 = vmatprep.subr.mxu1 %v75_v19  ;;  %207 = vmatpush3.msra.mxu0 %v58_v22 }
  0x23   :  { %250 = vmatpush3.msra.mxu1 %v59_v20  ;;  %208 = vmatprep.subr.mxu0 %v73_v23 }
  0x24   :  { %235 = vmatprep.subr.mxu1 %v74_v21  ;;  %209 = vmatpush3.msra.mxu0 %v57_v24 }
  0x25   :  { %251 = vmatpush3.msra.mxu1 %v58_v22  ;;  %210 = vmatprep.subr.mxu0 %v72_v25 }
  0x26   :  { %236 = vmatprep.subr.mxu1 %v73_v23  ;;  %211 = vmatpush3.msra.mxu0 %v56_v26 }
  0x27   :  { %252 = vmatpush3.msra.mxu1 %v57_v24  ;;  %212 = vmatprep.subr.mxu0 %v71_v27 }
  0x28   :  { %237 = vmatprep.subr.mxu1 %v72_v25  ;;  %213 = vmatpush3.msra.mxu0 %v55_v28 }
  0x29   :  { %253 = vmatpush3.msra.mxu1 %v56_v26  ;;  %214 = vmatprep.subr.mxu0 %v70_v29 }
  0x2a   :  { %238 = vmatprep.subr.mxu1 %v71_v27  ;;  %215 = vmatpush3.msra.mxu0 %v54_v30 }
  0x2b   :  { %254 = vmatpush3.msra.mxu1 %v55_v28  ;;  %216 = vmatprep.subr.mxu0 %v69_v31 }
  0x2c   :  { %239 = vmatprep.subr.mxu1 %v70_v29  ;;  %217 = vmatpush3.msra.mxu0 %v53_v32 }
  0x2d   :  { %255 = vmatpush3.msra.mxu1 %v54_v30  ;;  %218 = vmatprep.subr.mxu0 %v68_v33 }
  0x2e   :  { %240 = vmatprep.subr.mxu1 %v69_v31  ;;  %219 = vmatpush3.msra.mxu0 %v52_v34 }
  0x2f   :  { %256 = vmatpush3.msra.mxu1 %v53_v32 }
  0x30   :  { %241 = vmatprep.subr.mxu1 %v68_v33 }
  0x31   :  { %257 = vmatpush3.msra.mxu1 %v52_v34 }
  0x8b   :  { %v36_v38 = vpop.permute.xlu0 %35 }
  0x8c   :  { %vm40_vm0 = vcmp.eq.s32.totalorder %v32_v36, %v36_v38  ;;  %vm41_vm1 = vcmp.eq.s32.totalorder %v33_v37, %v36_v38 }
  0x8d   :  { %184 = vmatprep.mubr.msk.f32.mxu0 %vm41_vm1, %v313_v39 }
  0x8e   :  { %185 = vmatmul.mubr.msk.f32.vlgmr.msra.gmra.mxu0 %vm40_vm0, %v313_v39 }
  0x8f   :  { %v39_v40 = vpop.permute.xlu0 %38 }
  0x90   :  { %vm42_vm2 = vcmp.eq.s32.totalorder %v32_v36, %v39_v40  ;;  %vm43_vm3 = vcmp.eq.s32.totalorder %v33_v37, %v39_v40 }
  0x91   :  { %186 = vmatprep.mubr.msk.f32.mxu1 %vm43_vm3, %v313_v39 }
  0x92   :  { %187 = vmatmul.mubr.msk.f32.vlgmr.msra.gmra.mxu1 %vm42_vm2, %v313_v39 }
 0x14e   :  { %v220_v41 = vpop.f32.mrf.mxu0 }
 0x150   :  { %v221_v43 = vpop.f32.mrf.mxu0 }
 0x151   :  { %v222_v44 = vadd.f32 %v221_v43, %v220_v41 }
 0x152   :  { %v223_v45 = vpop.f32.mrf.mxu1 }
 0x153   :  { %v153_v46 = vadd.f32 %v222_v44, %v84_v42 }
 0x154   :  { %v224_v48 = vpop.f32.mrf.mxu1 }
 0x155   :  { %161 = vst [vmem:[#allocation5] sm:$0xff] %v153_v46  ;;  %v225_v49 = vadd.f32 %v224_v48, %v223_v45 }
 0x157   :  { %v158_v50 = vadd.f32 %v225_v49, %v85_v47 }
 0x159   :  { %162 = vst [vmem:[#allocation5 + $0x8] sm:$0xff] %v158_v50 }
 0x15a   :  { %296 = shalt.err (!%p293_p9)
}
 0x15b   :  { %174 = dma.vmem_to_hbm [thread:$0]  %s169_s26, 256, %s362_s3, [#allocation4], %s310_s15, %s310_s15, %s311_s16  }
 0x15c   :  { %307 = dma.done.wait [#allocation4], 256  }
 0x15d   :  { %308 = vsyncadd [#allocation4], 4294967040 }
 0x15e   :  { %178 = vsyncpa [#allocation3], 1 }
 0x15f   :  { %179 = vsyncpa [#allocation4], 1 }

</bundles_post_ra>
